<compile_context>
chip_gen: v7x
topology: tpu7x:2x2x1
jax: 0.10.0
libtpu: 0.0.40
codegen_flags: <defaults>
</compile_context>

<pallas_src>
import functools

import jax
import jax.numpy as jnp
import numpy as np
from jax.experimental import pallas as pl
from jax.experimental.pallas import tpu as pltpu


def _round_up(n: int, m: int) -> int:
    return ((n + m - 1) // m) * m


def _pad_hidden(h: int) -> int:
    # Lane-dense hidden dim; full 256-wide MXU passes on v6e/v7x for ragged
    # configs (BERT's 768 is already a multiple of 256; 128 suffices on v5e).
    return _round_up(h, 256) if h >= 256 else _round_up(h, 128)


# Constant-index operands (weights / bias): their index_map is always (0, 0),
# so a second pipeline buffer is pure VMEM waste -> request single buffering.
# Flipped to None (compiler default) at runtime if this JAX/Mosaic build
# rejects pipeline_mode=pl.Buffered(1).
_CONST_BUFFER_COUNT = 1


def _const_spec(shape):
    zeros = (0,) * len(shape)
    if _CONST_BUFFER_COUNT is not None:
        return pl.BlockSpec(shape, lambda *_: zeros,
                            pipeline_mode=pl.Buffered(_CONST_BUFFER_COUNT))
    return pl.BlockSpec(shape, lambda *_: zeros)


def _run(builder):
    """Build + run a pallas_call; retry once with default (double) buffering
    if single-buffered constant specs are not supported on this stack."""
    global _CONST_BUFFER_COUNT
    try:
        return builder()
    except Exception:
        if _CONST_BUFFER_COUNT is None:
            raise
        _CONST_BUFFER_COUNT = None
        return builder()


def _pick_tile(batch: int, tile_b) -> int:
    if tile_b is not None:
        return tile_b
    # Big enough to amortize the ~0.35us per-grid-step overhead, rounded to 16
    # (bf16 sublane pack), but split into >= 2 tiles when the batch allows it
    # so both v7x TensorCores get work.
    cap = 512
    two_way = max(16, _round_up(pl.cdiv(batch, 2), 16))
    return max(16, min(cap, two_way, _round_up(batch, 16)))


def _vmem_limit_bytes(tb, three_h, h_pad, c_pad, x_itemsize):
    wbuf = 1 if _CONST_BUFFER_COUNT == 1 else 2
    need = (2 * tb * three_h * x_itemsize                      # x tile (2 bufs)
            + wbuf * ((three_h + c_pad) * h_pad * 2 + h_pad * 4)  # W1/Wn/b1
            + 2 * tb * c_pad * 4                               # output blocks
            + 4 * tb * (h_pad + c_pad) * 4)                    # f32 intermediates
    return int(min(max(2 * need, 32 << 20), 64 << 20))


# ---------------------------------------------------------------------------
# Fused kernel (train): Accu head + per-tile cross-entropy partial sum.
# ---------------------------------------------------------------------------
def _accu_ce_kernel(x_ref, lbl_ref, w1_ref, b1_ref, wn_ref, psum_ref,
                    *, batch, num_class, tile_b, logit_scale):
    # In-kernel bf16 cast (activation arrives in its native dtype from HBM).
    x = x_ref[...].astype(jnp.bfloat16)
    # Linear(3H -> H): bf16 inputs, f32 accumulation on the MXU.
    h = jnp.dot(x, w1_ref[...], preferred_element_type=jnp.float32) + b1_ref[...]
    # Row L2 normalization, F.normalize semantics: x / max(||x||, eps).
    norm = jnp.maximum(jnp.sqrt(jnp.sum(h * h, axis=-1, keepdims=True)),
                       jnp.float32(1e-12))
    hn = h * (1.0 / norm)
    # Cosine logits against pre-normalized (hoisted) classifier weights.
    # TODO(synk): CosClassifier source unavailable; scale factor assumed 1.0.
    logits = jnp.dot(hn.astype(wn_ref.dtype), wn_ref[...],
                     preferred_element_type=jnp.float32)          # (tb, Cp)
    if logit_scale != 1.0:
        logits = logits * jnp.float32(logit_scale)

    col = jax.lax.broadcasted_iota(jnp.int32, logits.shape, 1)
    logits_m = jnp.where(col < num_class, logits, jnp.float32(-1e30))

    # Stable logsumexp + label pick (no one_hot; iota compare instead).
    m = jnp.max(logits_m, axis=-1, keepdims=True)
    lse = jnp.log(jnp.sum(jnp.exp(logits_m - m), axis=-1, keepdims=True)) + m
    picked = jnp.sum(jnp.where(col == lbl_ref[...], logits, 0.0),
                     axis=-1, keepdims=True)

    # Mask rows of the (garbage-padded) last partial batch block, reduce to
    # one dense partial-sum block per tile.
    row = (jax.lax.broadcasted_iota(jnp.int32, (tile_b, 1), 0)
           + pl.program_id(0) * tile_b)
    nll = jnp.where(row < batch, lse - picked, 0.0)               # (tb, 1)
    psum_ref[...] = jnp.broadcast_to(jnp.sum(nll, keepdims=True), (8, 128))


# ---------------------------------------------------------------------------
# Fused kernel (eval): Accu head + softmax.
# ---------------------------------------------------------------------------
def _accu_softmax_kernel(x_ref, w1_ref, b1_ref, wn_ref, probs_ref,
                         *, num_class, logit_scale):
    x = x_ref[...].astype(jnp.bfloat16)
    h = jnp.dot(x, w1_ref[...], preferred_element_type=jnp.float32) + b1_ref[...]
    norm = jnp.maximum(jnp.sqrt(jnp.sum(h * h, axis=-1, keepdims=True)),
                       jnp.float32(1e-12))
    hn = h * (1.0 / norm)
    logits = jnp.dot(hn.astype(wn_ref.dtype), wn_ref[...],
                     preferred_element_type=jnp.float32)          # (tb, Cp)
    if logit_scale != 1.0:
        logits = logits * jnp.float32(logit_scale)

    col = jax.lax.broadcasted_iota(jnp.int32, logits.shape, 1)
    logits = jnp.where(col < num_class, logits, jnp.float32(-1e30))
    m = jnp.max(logits, axis=-1, keepdims=True)
    e = jnp.exp(logits - m)
    denom = jnp.sum(e, axis=-1, keepdims=True)
    # Exact reciprocal on the (tb, 1) denominator: negligible cost, keeps row
    # sums == 1 to f32 precision before the output-dtype cast.
    probs_ref[...] = (e * (1.0 / denom)).astype(probs_ref.dtype)


# ---------------------------------------------------------------------------
# Wrappers
# ---------------------------------------------------------------------------
def _prep_weights(w1, b1, w2, h_pad, c_pad):
    """Cast to bf16, pad hidden/class dims, hoist the (constant) CosClassifier
    column L2-normalization out of the kernel."""
    H, C = w2.shape
    w1b = jnp.pad(w1.astype(jnp.bfloat16), ((0, 0), (0, h_pad - H)))
    b1f = jnp.pad(b1.astype(jnp.float32).reshape(1, -1),
                  ((0, 0), (0, h_pad - H)))
    w2f = jnp.pad(w2.astype(jnp.float32), ((0, h_pad - H), (0, c_pad - C)))
    norm = jnp.maximum(jnp.sqrt(jnp.sum(w2f * w2f, axis=0, keepdims=True)),
                       jnp.float32(1e-12))
    wn = (w2f / norm).astype(jnp.bfloat16)
    return w1b, b1f, wn


def accu_head_ce_mean(fact_rep, accu_labels, w1, b1, w2, *,
                      tile_b=None, logit_scale=1.0):
    """mean_i CE(CosClassifier(Linear(fact_rep))_i, accu_labels_i)."""
    B, three_h = fact_rep.shape
    H, C = w2.shape
    h_pad = _pad_hidden(H)
    c_pad = _round_up(C, 128)
    tb = _pick_tile(B, tile_b)
    n_tiles = pl.cdiv(B, tb)

    lbl = accu_labels.astype(jnp.int32).reshape(B, 1)
    w1b, b1f, wn = _prep_weights(w1, b1, w2, h_pad, c_pad)
    x_isz = fact_rep.dtype.itemsize

    cost = pl.CostEstimate(
        flops=int(2 * B * three_h * h_pad + 2 * B * h_pad * c_pad),
        transcendentals=int(B * (c_pad + 2)),
        bytes_accessed=int(B * three_h * x_isz + B * 4
                           + (three_h + c_pad) * h_pad * 2 + h_pad * 4
                           + n_tiles * 8 * 128 * 4))

    def build():
        return pl.pallas_call(
            functools.partial(_accu_ce_kernel, batch=B, num_class=C,
                              tile_b=tb, logit_scale=logit_scale),
            out_shape=jax.ShapeDtypeStruct((n_tiles * 8, 128), jnp.float32),
            grid=(n_tiles,),
            in_specs=[
                pl.BlockSpec((tb, three_h), lambda i: (i, 0)),   # fact_rep tile
                pl.BlockSpec((tb, 1), lambda i: (i, 0)),         # labels tile
                _const_spec((three_h, h_pad)),                   # W1 (resident)
                _const_spec((1, h_pad)),                         # b1 (resident)
                _const_spec((h_pad, c_pad)),                     # Wn (resident)
            ],
            out_specs=pl.BlockSpec((8, 128), lambda i: (i, 0)),
            compiler_params=pltpu.CompilerParams(
                dimension_semantics=("parallel",),
                vmem_limit_bytes=_vmem_limit_bytes(tb, three_h, h_pad, c_pad,
                                                   x_isz)),
            cost_estimate=cost,
        )(fact_rep, lbl, w1b, b1f, wn)

    partials = _run(build)
    tile_sums = partials.reshape(n_tiles, 8, 128)[:, 0, 0]
    return jnp.sum(tile_sums) / jnp.float32(B)


def accu_head_softmax(fact_rep, w1, b1, w2, *, tile_b=None, logit_scale=1.0,
                      out_dtype=jnp.bfloat16):
    """softmax(CosClassifier(Linear(fact_rep)), axis=-1)."""
    B, three_h = fact_rep.shape
    H, C = w2.shape
    h_pad = _pad_hidden(H)
    c_pad = _round_up(C, 128)
    tb = _pick_tile(B, tile_b)
    n_tiles = pl.cdiv(B, tb)

    w1b, b1f, wn = _prep_weights(w1, b1, w2, h_pad, c_pad)
    x_isz = fact_rep.dtype.itemsize
    out_isz = jnp.dtype(out_dtype).itemsize

    cost = pl.CostEstimate(
        flops=int(2 * B * three_h * h_pad + 2 * B * h_pad * c_pad),
        transcendentals=int(B * (c_pad + 2)),
        bytes_accessed=int(B * three_h * x_isz
                           + (three_h + c_pad) * h_pad * 2 + h_pad * 4
                           + B * c_pad * out_isz))

    def build():
        return pl.pallas_call(
            functools.partial(_accu_softmax_kernel, num_class=C,
                              logit_scale=logit_scale),
            out_shape=jax.ShapeDtypeStruct((B, c_pad), out_dtype),
            grid=(n_tiles,),
            in_specs=[
                pl.BlockSpec((tb, three_h), lambda i: (i, 0)),
                _const_spec((three_h, h_pad)),
                _const_spec((1, h_pad)),
                _const_spec((h_pad, c_pad)),
            ],
            out_specs=pl.BlockSpec((tb, c_pad), lambda i: (i, 0)),
            compiler_params=pltpu.CompilerParams(
                dimension_semantics=("parallel",),
                vmem_limit_bytes=_vmem_limit_bytes(tb, three_h, h_pad, c_pad,
                                                   x_isz)),
            cost_estimate=cost,
        )(fact_rep, w1b, b1f, wn)

    probs = _run(build)
    return probs[:, :C]


# Tiny group path (G ~ 4): plain XLA — a pallas_call here is pure overhead.
def _ce_mean_xla(logits, labels):
    logits = logits.astype(jnp.float32)
    m = jnp.max(logits, axis=-1, keepdims=True)
    lse = jnp.log(jnp.sum(jnp.exp(logits - m), axis=-1, keepdims=True)) + m
    picked = jnp.take_along_axis(logits, labels.astype(jnp.int32)[:, None],
                                 axis=-1)
    return jnp.mean(lse - picked)


# ---------------------------------------------------------------------------
# LADAN_Bert_C forward (head portion).
# ---------------------------------------------------------------------------
# TODO(synk): Ladan_criminal (PLM + graph distillation) source is unavailable;
#             fact_rep / group_pred_prior are taken as inputs here.
def ladan_bert_c_forward(fact_rep, group_pred_prior, accu_labels, group_labels,
                         params, model_type='train'):
    if model_type == 'train':
        charge_loss = accu_head_ce_mean(fact_rep, accu_labels,
                                        params['w1'], params['b1'],
                                        params['w2'])
        group_loss = _ce_mean_xla(group_pred_prior, group_labels)
        total = charge_loss + 0.1 * group_loss
        return {'loss_charge': charge_loss,
                'loss_graph_pri': group_loss,
                'loss': total}
    else:
        charge_pred = accu_head_softmax(fact_rep, params['w1'], params['b1'],
                                        params['w2'])
        group_pred_pri = jax.nn.softmax(group_pred_prior.astype(jnp.float32),
                                        axis=-1)
        return {'charge_pred': charge_pred, 'group_pred_pri': group_pred_pri}


# ---------------------------------------------------------------------------
# Pure-JAX reference (for sanity checking the fused kernels).
# ---------------------------------------------------------------------------
def _ref_head(fact_rep, w1, b1, w2):
    h = fact_rep.astype(jnp.float32) @ w1.astype(jnp.float32) + b1.astype(jnp.float32)
    hn = h / jnp.maximum(jnp.linalg.norm(h, axis=-1, keepdims=True), 1e-12)
    wn = w2 / jnp.maximum(jnp.linalg.norm(w2.astype(jnp.float32), axis=0,
                                          keepdims=True), 1e-12)
    return hn @ wn


if __name__ == "__main__":
    # small, forward-consistent shapes
    B = 2            # batch
    H = 32           # hidden_size
    C = 8            # accu_num (num_class)
    G = 4            # group_num

    key = jax.random.PRNGKey(0)
    k1, k2, k3, k4, k5, k6, k7 = jax.random.split(key, 7)

    # deterministic synthetic parameters (shapes from module __init__):
    #   Accu_decoder_m: Linear(3H -> H)  -> stored transposed (3H, H)
    #   Accu_decoder  : CosClassifier weight (C, H) -> stored transposed (H, C)
    params = {
        'w1': jax.random.normal(k1, (3 * H, H), jnp.float32) * 0.05,
        'b1': jax.random.normal(k2, (1, H), jnp.float32) * 0.01,
        'w2': jax.random.normal(k3, (H, C), jnp.float32) * 0.05,
    }

    # synthetic sub-model outputs / labels
    fact_rep = jax.random.normal(k4, (B, 3 * H), jnp.float32)
    group_pred_prior = jax.random.normal(k5, (B, G), jnp.float32)
    accu_labels = jax.random.randint(k6, (B,), 0, C)
    group_labels = jax.random.randint(k7, (B,), 0, G)

    train_out = ladan_bert_c_forward(fact_rep, group_pred_prior,
                                     accu_labels, group_labels,
                                     params, model_type='train')
    eval_out = ladan_bert_c_forward(fact_rep, group_pred_prior,
                                    accu_labels, group_labels,
                                    params, model_type='eval')

    jax.block_until_ready(train_out['loss'])
    jax.block_until_ready(eval_out['charge_pred'])
    jax.block_until_ready(eval_out['group_pred_pri'])

    # --- sanity check against a pure-JAX f32 reference (loose tol: bf16 MXU) ---
    ref_logits = _ref_head(fact_rep, params['w1'], params['b1'], params['w2'])
    ref_charge_loss = _ce_mean_xla(ref_logits, accu_labels)
    ref_group_loss = _ce_mean_xla(group_pred_prior, group_labels)
    ref_loss = ref_charge_loss + 0.1 * ref_group_loss
    ref_probs = jax.nn.softmax(ref_logits, axis=-1)

    assert np.isfinite(float(train_out['loss']))
    assert np.allclose(float(train_out['loss']), float(ref_loss),
                       rtol=5e-2, atol=5e-2), \
        (float(train_out['loss']), float(ref_loss))
    assert np.allclose(np.asarray(eval_out['charge_pred'], dtype=np.float32),
                       np.asarray(ref_probs), atol=3e-2), "eval probs mismatch"
    row_sums = np.asarray(eval_out['charge_pred'],
                          dtype=np.float32).sum(axis=-1)
    assert np.allclose(row_sums, 1.0, atol=3e-2), row_sums

    print("KERNEL_OK")
</pallas_src>

<mosaic_0001>
module attributes {stable_mosaic.version = 11 : i64} {
  func.func @_accu_ce_kernel(%arg0: i32, %arg1: memref<16x96xf32, #tpu.memory_space<vmem>>, %arg2: memref<16x1xi32, #tpu.memory_space<vmem>>, %arg3: memref<96x128xbf16, #tpu.memory_space<vmem>>, %arg4: memref<1x128xf32, #tpu.memory_space<vmem>>, %arg5: memref<128x128xbf16, #tpu.memory_space<vmem>>, %arg6: memref<8x128xf32, #tpu.memory_space<vmem>>) attributes {dimension_semantics = [#tpu.dimension_semantics<parallel>], iteration_bounds = array<i64: 1>, scalar_prefetch = 0 : i64, scratch_operands = 0 : i64, tpu.core_type = #tpu.core_type<tc>, window_params = [{transform_indices = @transform_0, window_bounds = array<i64: 16, 96>}, {transform_indices = @transform_1, window_bounds = array<i64: 16, 1>}, {pipeline_mode = #tpu.pipeline_mode<synchronous>, transform_indices = @transform_2, window_bounds = array<i64: 96, 128>}, {pipeline_mode = #tpu.pipeline_mode<synchronous>, transform_indices = @transform_3, window_bounds = array<i64: 1, 128>}, {pipeline_mode = #tpu.pipeline_mode<synchronous>, transform_indices = @transform_4, window_bounds = array<i64: 128, 128>}, {transform_indices = @transform_5, window_bounds = array<i64: 8, 128>}]} {
    %c0 = arith.constant 0 : index
    %c0_0 = arith.constant 0 : index
    %0 = vector.load %arg1[%c0, %c0_0] : memref<16x96xf32, #tpu.memory_space<vmem>>, vector<16x96xf32>
    %1 = arith.truncf %0 : vector<16x96xf32> to vector<16x96xbf16>
    %c0_1 = arith.constant 0 : index
    %c0_2 = arith.constant 0 : index
    %2 = vector.load %arg3[%c0_1, %c0_2] : memref<96x128xbf16, #tpu.memory_space<vmem>>, vector<96x128xbf16>
    %cst = arith.constant dense<0.000000e+00> : vector<16x128xf32>
    %3 = tpu.matmul %1, %2, %cst {dimension_numbers = #tpu.dot_dimension_numbers<[1], [0], [0], [1], [0, 0, 1, 1], [], []>} : vector<16x96xbf16>, vector<96x128xbf16>, vector<16x128xf32> -> vector<16x128xf32>
    %c0_3 = arith.constant 0 : index
    %c0_4 = arith.constant 0 : index
    %4 = vector.load %arg4[%c0_3, %c0_4] : memref<1x128xf32, #tpu.memory_space<vmem>>, vector<1x128xf32>
    %5 = vector.broadcast %4 : vector<1x128xf32> to vector<16x128xf32>
    %6 = arith.addf %3, %5 : vector<16x128xf32>
    %7 = arith.mulf %6, %6 : vector<16x128xf32>
    %cst_5 = arith.constant dense<0.000000e+00> : vector<16xf32>
    %8 = vector.multi_reduction <add>, %7, %cst_5 [1] : vector<16x128xf32> to vector<16xf32>
    %9 = vector.shape_cast %8 : vector<16xf32> to vector<16x1xf32>
    %10 = math.sqrt %9 : vector<16x1xf32>
    %cst_6 = arith.constant 9.99999996E-13 : f32
    %11 = vector.broadcast %cst_6 : f32 to vector<16x1xf32>
    %12 = arith.maximumf %10, %11 : vector<16x1xf32>
    %cst_7 = arith.constant 1.000000e+00 : f32
    %13 = vector.broadcast %cst_7 : f32 to vector<16x1xf32>
    %14 = arith.divf %13, %12 : vector<16x1xf32>
    %15 = vector.broadcast %14 : vector<16x1xf32> to vector<16x128xf32>
    %16 = arith.mulf %6, %15 : vector<16x128xf32>
    %17 = arith.truncf %16 : vector<16x128xf32> to vector<16x128xbf16>
    %c0_8 = arith.constant 0 : index
    %c0_9 = arith.constant 0 : index
    %18 = vector.load %arg5[%c0_8, %c0_9] : memref<128x128xbf16, #tpu.memory_space<vmem>>, vector<128x128xbf16>
    %cst_10 = arith.constant dense<0.000000e+00> : vector<16x128xf32>
    %19 = tpu.matmul %17, %18, %cst_10 {dimension_numbers = #tpu.dot_dimension_numbers<[1], [0], [0], [1], [0, 0, 1, 1], [], []>} : vector<16x128xbf16>, vector<128x128xbf16>, vector<16x128xf32> -> vector<16x128xf32>
    %20 = tpu.iota {dimensions = array<i32: 1>} : vector<16x128xi32>
    %c8_i32 = arith.constant 8 : i32
    %21 = vector.broadcast %c8_i32 : i32 to vector<16x128xi32>
    %22 = arith.cmpi slt, %20, %21 : vector<16x128xi32>
    %cst_11 = arith.constant -1.000000e+30 : f32
    %23 = vector.broadcast %cst_11 : f32 to vector<16x128xf32>
    %24 = arith.select %22, %19, %23 : vector<16x128xi1>, vector<16x128xf32>
    %cst_12 = arith.constant dense<0xFF800000> : vector<16xf32>
    %25 = vector.multi_reduction <maximumf>, %24, %cst_12 [1] : vector<16x128xf32> to vector<16xf32>
    %26 = vector.shape_cast %25 : vector<16xf32> to vector<16x1xf32>
    %27 = vector.broadcast %26 : vector<16x1xf32> to vector<16x128xf32>
    %28 = arith.subf %24, %27 : vector<16x128xf32>
    %29 = math.exp %28 : vector<16x128xf32>
    %cst_13 = arith.constant dense<0.000000e+00> : vector<16xf32>
    %30 = vector.multi_reduction <add>, %29, %cst_13 [1] : vector<16x128xf32> to vector<16xf32>
    %31 = vector.shape_cast %30 : vector<16xf32> to vector<16x1xf32>
    %32 = math.log %31 : vector<16x1xf32>
    %33 = arith.addf %32, %26 : vector<16x1xf32>
    %c0_14 = arith.constant 0 : index
    %c0_15 = arith.constant 0 : index
    %34 = vector.load %arg2[%c0_14, %c0_15] : memref<16x1xi32, #tpu.memory_space<vmem>>, vector<16x1xi32>
    %35 = vector.broadcast %34 : vector<16x1xi32> to vector<16x128xi32>
    %36 = arith.cmpi eq, %20, %35 : vector<16x128xi32>
    %cst_16 = arith.constant 0.000000e+00 : f32
    %37 = vector.broadcast %cst_16 : f32 to vector<16x128xf32>
    %38 = arith.select %36, %19, %37 : vector<16x128xi1>, vector<16x128xf32>
    %cst_17 = arith.constant dense<0.000000e+00> : vector<16xf32>
    %39 = vector.multi_reduction <add>, %38, %cst_17 [1] : vector<16x128xf32> to vector<16xf32>
    %40 = vector.shape_cast %39 : vector<16xf32> to vector<16x1xf32>
    %41 = tpu.iota {dimensions = array<i32: 0>} : vector<16x1xi32>
    %c16_i32 = arith.constant 16 : i32
    %42 = arith.muli %arg0, %c16_i32 : i32
    %43 = vector.broadcast %42 : i32 to vector<16x1xi32>
    %44 = arith.addi %41, %43 : vector<16x1xi32>
    %c2_i32 = arith.constant 2 : i32
    %45 = vector.broadcast %c2_i32 : i32 to vector<16x1xi32>
    %46 = arith.cmpi slt, %44, %45 : vector<16x1xi32>
    %47 = arith.subf %33, %40 : vector<16x1xf32>
    %cst_18 = arith.constant 0.000000e+00 : f32
    %48 = vector.broadcast %cst_18 : f32 to vector<16x1xf32>
    %49 = arith.select %46, %47, %48 : vector<16x1xi1>, vector<16x1xf32>
    %50 = vector.shape_cast %49 : vector<16x1xf32> to vector<1x16x1xf32>
    %cst_19 = arith.constant dense<0.000000e+00> : vector<1xf32>
    %51 = vector.multi_reduction <add>, %50, %cst_19 [1, 2] : vector<1x16x1xf32> to vector<1xf32>
    %52 = vector.shape_cast %51 : vector<1xf32> to vector<1x1x1xf32>
    %53 = vector.extract %52[0, 0, 0] : f32 from vector<1x1x1xf32>
    %54 = vector.broadcast %53 : f32 to vector<1x1xf32>
    %55 = vector.shape_cast %54 : vector<1x1xf32> to vector<1x1xf32>
    %56 = vector.broadcast %55 : vector<1x1xf32> to vector<8x128xf32>
    %c0_20 = arith.constant 0 : index
    %c0_21 = arith.constant 0 : index
    %57 = vector.load %arg6[%c0_20, %c0_21] : memref<8x128xf32, #tpu.memory_space<vmem>>, vector<8x128xf32>
    tpu.vector_store %arg6[%c0_20, %c0_21], %56 {strides = array<i32>} : memref<8x128xf32, #tpu.memory_space<vmem>>, vector<8x128xf32>,
    return
  }
  func.func @transform_0(%arg0: i32) -> (i32, i32) {
    %c0_i32 = arith.constant 0 : i32
    %c0_i32_0 = arith.constant 0 : i32
    return %arg0, %c0_i32 : i32, i32
  }
  func.func @transform_1(%arg0: i32) -> (i32, i32) {
    %c0_i32 = arith.constant 0 : i32
    %c0_i32_0 = arith.constant 0 : i32
    return %arg0, %c0_i32 : i32, i32
  }
  func.func @transform_2(%arg0: i32) -> (i32, i32) {
    %c0_i32 = arith.constant 0 : i32
    %c0_i32_0 = arith.constant 0 : i32
    %c0_i32_1 = arith.constant 0 : i32
    return %c0_i32, %c0_i32_0 : i32, i32
  }
  func.func @transform_3(%arg0: i32) -> (i32, i32) {
    %c0_i32 = arith.constant 0 : i32
    %c0_i32_0 = arith.constant 0 : i32
    %c0_i32_1 = arith.constant 0 : i32
    return %c0_i32, %c0_i32_0 : i32, i32
  }
  func.func @transform_4(%arg0: i32) -> (i32, i32) {
    %c0_i32 = arith.constant 0 : i32
    %c0_i32_0 = arith.constant 0 : i32
    %c0_i32_1 = arith.constant 0 : i32
    return %c0_i32, %c0_i32_0 : i32, i32
  }
  func.func @transform_5(%arg0: i32) -> (i32, i32) {
    %c0_i32 = arith.constant 0 : i32
    %c0_i32_0 = arith.constant 0 : i32
    return %arg0, %c0_i32 : i32, i32
  }
}

module attributes {stable_mosaic.version = 11 : i64} {
  func.func @_accu_ce_kernel(%arg0: i32, %arg1: memref<16x96xf32, #tpu.memory_space<vmem>>, %arg2: memref<16x1xi32, #tpu.memory_space<vmem>>, %arg3: memref<96x128xbf16, #tpu.memory_space<vmem>>, %arg4: memref<1x128xf32, #tpu.memory_space<vmem>>, %arg5: memref<128x128xbf16, #tpu.memory_space<vmem>>, %arg6: memref<8x128xf32, #tpu.memory_space<vmem>>) attributes {dimension_semantics = [#tpu.dimension_semantics<parallel>], iteration_bounds = array<i64: 1>, scalar_prefetch = 0 : i64, scratch_operands = 0 : i64, tpu.core_type = #tpu.core_type<tc>, window_params = [{transform_indices = @transform_0, window_bounds = array<i64: 16, 96>}, {transform_indices = @transform_1, window_bounds = array<i64: 16, 1>}, {pipeline_mode = #tpu.pipeline_mode<synchronous>, transform_indices = @transform_2, window_bounds = array<i64: 96, 128>}, {pipeline_mode = #tpu.pipeline_mode<synchronous>, transform_indices = @transform_3, window_bounds = array<i64: 1, 128>}, {pipeline_mode = #tpu.pipeline_mode<synchronous>, transform_indices = @transform_4, window_bounds = array<i64: 128, 128>}, {transform_indices = @transform_5, window_bounds = array<i64: 8, 128>}]} {
    %c0 = arith.constant 0 : index
    %c0_0 = arith.constant 0 : index
    %0 = vector.load %arg1[%c0, %c0_0] : memref<16x96xf32, #tpu.memory_space<vmem>>, vector<16x96xf32>
    %1 = arith.truncf %0 : vector<16x96xf32> to vector<16x96xbf16>
    %c0_1 = arith.constant 0 : index
    %c0_2 = arith.constant 0 : index
    %2 = vector.load %arg3[%c0_1, %c0_2] : memref<96x128xbf16, #tpu.memory_space<vmem>>, vector<96x128xbf16>
    %cst = arith.constant dense<0.000000e+00> : vector<16x128xf32>
    %3 = tpu.matmul %1, %2, %cst {dimension_numbers = #tpu.dot_dimension_numbers<[1], [0], [0], [1], [0, 0, 1, 1], [], []>} : vector<16x96xbf16>, vector<96x128xbf16>, vector<16x128xf32> -> vector<16x128xf32>
    %c0_3 = arith.constant 0 : index
    %c0_4 = arith.constant 0 : index
    %4 = vector.load %arg4[%c0_3, %c0_4] : memref<1x128xf32, #tpu.memory_space<vmem>>, vector<1x128xf32>
    %5 = vector.broadcast %4 : vector<1x128xf32> to vector<16x128xf32>
    %6 = arith.addf %3, %5 : vector<16x128xf32>
    %7 = arith.mulf %6, %6 : vector<16x128xf32>
    %cst_5 = arith.constant dense<0.000000e+00> : vector<16xf32>
    %8 = vector.multi_reduction <add>, %7, %cst_5 [1] : vector<16x128xf32> to vector<16xf32>
    %9 = vector.shape_cast %8 : vector<16xf32> to vector<16x1xf32>
    %10 = math.sqrt %9 : vector<16x1xf32>
    %cst_6 = arith.constant 9.99999996E-13 : f32
    %11 = vector.broadcast %cst_6 : f32 to vector<16x1xf32>
    %12 = arith.maximumf %10, %11 : vector<16x1xf32>
    %cst_7 = arith.constant 1.000000e+00 : f32
    %13 = vector.broadcast %cst_7 : f32 to vector<16x1xf32>
    %14 = arith.divf %13, %12 : vector<16x1xf32>
    %15 = vector.broadcast %14 : vector<16x1xf32> to vector<16x128xf32>
    %16 = arith.mulf %6, %15 : vector<16x128xf32>
    %17 = arith.truncf %16 : vector<16x128xf32> to vector<16x128xbf16>
    %c0_8 = arith.constant 0 : index
    %c0_9 = arith.constant 0 : index
    %18 = vector.load %arg5[%c0_8, %c0_9] : memref<128x128xbf16, #tpu.memory_space<vmem>>, vector<128x128xbf16>
    %cst_10 = arith.constant dense<0.000000e+00> : vector<16x128xf32>
    %19 = tpu.matmul %17, %18, %cst_10 {dimension_numbers = #tpu.dot_dimension_numbers<[1], [0], [0], [1], [0, 0, 1, 1], [], []>} : vector<16x128xbf16>, vector<128x128xbf16>, vector<16x128xf32> -> vector<16x128xf32>
    %20 = tpu.iota {dimensions = array<i32: 1>} : vector<16x128xi32>
    %c8_i32 = arith.constant 8 : i32
    %21 = vector.broadcast %c8_i32 : i32 to vector<16x128xi32>
    %22 = arith.cmpi slt, %20, %21 : vector<16x128xi32>
    %cst_11 = arith.constant -1.000000e+30 : f32
    %23 = vector.broadcast %cst_11 : f32 to vector<16x128xf32>
    %24 = arith.select %22, %19, %23 : vector<16x128xi1>, vector<16x128xf32>
    %cst_12 = arith.constant dense<0xFF800000> : vector<16xf32>
    %25 = vector.multi_reduction <maximumf>, %24, %cst_12 [1] : vector<16x128xf32> to vector<16xf32>
    %26 = vector.shape_cast %25 : vector<16xf32> to vector<16x1xf32>
    %27 = vector.broadcast %26 : vector<16x1xf32> to vector<16x128xf32>
    %28 = arith.subf %24, %27 : vector<16x128xf32>
    %29 = math.exp %28 : vector<16x128xf32>
    %cst_13 = arith.constant dense<0.000000e+00> : vector<16xf32>
    %30 = vector.multi_reduction <add>, %29, %cst_13 [1] : vector<16x128xf32> to vector<16xf32>
    %31 = vector.shape_cast %30 : vector<16xf32> to vector<16x1xf32>
    %32 = math.log %31 : vector<16x1xf32>
    %33 = arith.addf %32, %26 : vector<16x1xf32>
    %c0_14 = arith.constant 0 : index
    %c0_15 = arith.constant 0 : index
    %34 = vector.load %arg2[%c0_14, %c0_15] : memref<16x1xi32, #tpu.memory_space<vmem>>, vector<16x1xi32>
    %35 = vector.broadcast %34 : vector<16x1xi32> to vector<16x128xi32>
    %36 = arith.cmpi eq, %20, %35 : vector<16x128xi32>
    %cst_16 = arith.constant 0.000000e+00 : f32
    %37 = vector.broadcast %cst_16 : f32 to vector<16x128xf32>
    %38 = arith.select %36, %19, %37 : vector<16x128xi1>, vector<16x128xf32>
    %cst_17 = arith.constant dense<0.000000e+00> : vector<16xf32>
    %39 = vector.multi_reduction <add>, %38, %cst_17 [1] : vector<16x128xf32> to vector<16xf32>
    %40 = vector.shape_cast %39 : vector<16xf32> to vector<16x1xf32>
    %41 = tpu.iota {dimensions = array<i32: 0>} : vector<16x1xi32>
    %c16_i32 = arith.constant 16 : i32
    %42 = arith.muli %arg0, %c16_i32 : i32
    %43 = vector.broadcast %42 : i32 to vector<16x1xi32>
    %44 = arith.addi %41, %43 : vector<16x1xi32>
    %c2_i32 = arith.constant 2 : i32
    %45 = vector.broadcast %c2_i32 : i32 to vector<16x1xi32>
    %46 = arith.cmpi slt, %44, %45 : vector<16x1xi32>
    %47 = arith.subf %33, %40 : vector<16x1xf32>
    %cst_18 = arith.constant 0.000000e+00 : f32
    %48 = vector.broadcast %cst_18 : f32 to vector<16x1xf32>
    %49 = arith.select %46, %47, %48 : vector<16x1xi1>, vector<16x1xf32>
    %50 = vector.shape_cast %49 : vector<16x1xf32> to vector<1x16x1xf32>
    %cst_19 = arith.constant dense<0.000000e+00> : vector<1xf32>
    %51 = vector.multi_reduction <add>, %50, %cst_19 [1, 2] : vector<1x16x1xf32> to vector<1xf32>
    %52 = vector.shape_cast %51 : vector<1xf32> to vector<1x1x1xf32>
    %53 = vector.extract %52[0, 0, 0] : f32 from vector<1x1x1xf32>
    %54 = vector.broadcast %53 : f32 to vector<1x1xf32>
    %55 = vector.shape_cast %54 : vector<1x1xf32> to vector<1x1xf32>
    %56 = vector.broadcast %55 : vector<1x1xf32> to vector<8x128xf32>
    %c0_20 = arith.constant 0 : index
    %c0_21 = arith.constant 0 : index
    %57 = vector.load %arg6[%c0_20, %c0_21] : memref<8x128xf32, #tpu.memory_space<vmem>>, vector<8x128xf32>
    tpu.vector_store %arg6[%c0_20, %c0_21], %56 {strides = array<i32>} : memref<8x128xf32, #tpu.memory_space<vmem>>, vector<8x128xf32>,
    return
  }
  func.func @transform_0(%arg0: i32) -> (i32, i32) {
    %c0_i32 = arith.constant 0 : i32
    %c0_i32_0 = arith.constant 0 : i32
    return %arg0, %c0_i32 : i32, i32
  }
  func.func @transform_1(%arg0: i32) -> (i32, i32) {
    %c0_i32 = arith.constant 0 : i32
    %c0_i32_0 = arith.constant 0 : i32
    return %arg0, %c0_i32 : i32, i32
  }
  func.func @transform_2(%arg0: i32) -> (i32, i32) {
    %c0_i32 = arith.constant 0 : i32
    %c0_i32_0 = arith.constant 0 : i32
    %c0_i32_1 = arith.constant 0 : i32
    return %c0_i32, %c0_i32_0 : i32, i32
  }
  func.func @transform_3(%arg0: i32) -> (i32, i32) {
    %c0_i32 = arith.constant 0 : i32
    %c0_i32_0 = arith.constant 0 : i32
    %c0_i32_1 = arith.constant 0 : i32
    return %c0_i32, %c0_i32_0 : i32, i32
  }
  func.func @transform_4(%arg0: i32) -> (i32, i32) {
    %c0_i32 = arith.constant 0 : i32
    %c0_i32_0 = arith.constant 0 : i32
    %c0_i32_1 = arith.constant 0 : i32
    return %c0_i32, %c0_i32_0 : i32, i32
  }
  func.func @transform_5(%arg0: i32) -> (i32, i32) {
    %c0_i32 = arith.constant 0 : i32
    %c0_i32_0 = arith.constant 0 : i32
    return %arg0, %c0_i32 : i32, i32
  }
}

</mosaic_0001>

<bundles_post_ra>
// kernel: tpu_custom_call.1
= control target key start
LH: loop header
LB: loop body
LE: loop exit
PB: predicated region body
PF: predicated region fallthrough
CT: control target
= control target key end

     0   :  { %10 = vsyncpa [#allocation3], 0  ;;  %s636_s0 = inlined_call_operand.vmem [shape: f32[2,96], index: 0, kind: input, shape index: {}]   ;;  %s637_s1 = inlined_call_operand.vmem [shape: s32[2,1], index: 1, kind: input, shape index: {}]   ;;  %s638_s2 = inlined_call_operand.hbm [shape: bf16[96,128], index: 2, kind: input, shape index: {}]   ;;  %s639_s3 = inlined_call_operand.vmem [shape: f32[1,128], index: 3, kind: input, shape index: {}]   ;;  %s640_s4 = inlined_call_operand.hbm [shape: bf16[128,128], index: 4, kind: input, shape index: {}]   ;;  %s641_s5 = inlined_call_operand.hbm [shape: f32[8,128], index: 5, kind: output, shape index: {}]  }
   0x1   :  { %11 = vsyncpa [#allocation6], 0 }
   0x2   :  { %12 = vsyncpa [#allocation4], 0  ;;  %s550_s18 = smov [#allocation2]   ;;  %s478_s22 = scalar_lea.hbm %s638_s2, 768 }
   0x3   :  { %s22_s19 = sshll.u32 %s550_s18, 4  ;;  %p479_p0 = scmp.ne.s32.totalorder %s638_s2, %s478_s22  ;;  %s23_s19 = int_to_ptr.vmem [resolvable:$true] %s22_s19 }
   0x4   :  { %p482_p1 = scmp.lt.u32.totalorder %s478_s22, %s638_s2 }
   0x6   :  { %p484_p2 = pnand %p482_p1, %p479_p0 }
   0x8   :  { %487 = shalt.err (!%p484_p2)
}
   0x9   :  { %s488_s27 = scalar_lea.vmem %s23_s19, 768  ;;  %p493_p4 = scmp.lt.s32.totalorder %s23_s19, %s23_s19 }
   0xa   :  { %p489_p3 = scmp.ne.s32.totalorder %s23_s19, %s488_s27  ;;  %p494_p5 = scmp.lt.s32.totalorder %s488_s27, %s488_s27 }
   0xc   :  { %p495_p6 = por %p494_p5, %p493_p4 }
   0xe   :  { %p496_p7 = pnand %p495_p6, %p489_p3 }
  0x10   :  { %499 = shalt.err (!%p496_p7)
}
  0x11   :  { %s551_s28 = smov 64   ;;  %s552_s29 = smov 4  }
  0x12   :  { %28 = dma.hbm_to_vmem [thread:$0]  %s638_s2, 768, %s23_s19, [#allocation3], %s551_s28, %s551_s28, %s552_s29  }
  0x13   :  { %s553_s7 = smov [#allocation5]   ;;  %s500_s11 = scalar_lea.hbm %s640_s4, 1024 }
  0x14   :  { %s36_s8 = sshll.u32 %s553_s7, 4  ;;  %p501_p8 = scmp.ne.s32.totalorder %s640_s4, %s500_s11  ;;  %s37_s8 = int_to_ptr.vmem [resolvable:$true] %s36_s8 }
  0x15   :  { %p504_p9 = scmp.lt.u32.totalorder %s500_s11, %s640_s4 }
  0x17   :  { %p506_p10 = pnand %p504_p9, %p501_p8 }
  0x19   :  { %509 = shalt.err (!%p506_p10)
}
  0x1a   :  { %s510_s16 = scalar_lea.vmem %s37_s8, 1024  ;;  %p515_p12 = scmp.lt.s32.totalorder %s37_s8, %s37_s8 }
  0x1b   :  { %p511_p11 = scmp.ne.s32.totalorder %s37_s8, %s510_s16  ;;  %p516_p13 = scmp.lt.s32.totalorder %s510_s16, %s510_s16 }
  0x1d   :  { %p517_p0 = por %p516_p13, %p515_p12 }
  0x1f   :  { %p518_p1 = pnand %p517_p0, %p511_p11 }
  0x21   :  { %521 = shalt.err (!%p518_p1)
}
  0x22   :  { %42 = dma.hbm_to_vmem [thread:$0]  %s640_s4, 1024, %s37_s8, [#allocation6], %s551_s28, %s551_s28, %s552_s29  }
  0x23   :  { %544 = dma.done.wait [#allocation3], 768  }
  0x24   :  { %545 = vsyncadd [#allocation3], 4294966528 }
  0x25   :  { %546 = dma.done.wait [#allocation6], 1024  }
  0x26   :  { %547 = vsyncadd [#allocation6], 4294966272  ;;  %v554_v0 = vmov 0.0   ;;  %vm555_vm0 = vmmov 0   ;;  %v452_v1 = vld [vmem:[#allocation2] sm:$0xff]   ;;  %v453_v2 = vld [vmem:[#allocation2 + $0x8] sm:$0xff]   ;;  %v287_v47 = vlaneseq }
  0x27   :  { %404 = vmatprep.subr.bf16.mxu0 %v554_v0  ;;  %416 = vmatprep.mubr.msk.bf16.mxu0 %vm555_vm0, %v554_v0  ;;  %v454_v3 = vld [vmem:[#allocation2 + $0x10] sm:$0xff]   ;;  %v455_v4 = vld [vmem:[#allocation2 + $0x18] sm:$0xff]   ;;  %v456_v5 = vld [vmem:[#allocation2 + $0x20] sm:$0xff]   ;;  %vm108_vm1 = vcmask 785408   ;;  %v556_v46 = vmov 0   ;;  %vm341_vm9 = vcmask 7168  }
  0x28   :  { %420 = vmatprep.subr.bf16.mxu1 %v554_v0  ;;  %436 = vmatprep.mubr.msk.bf16.mxu1 %vm555_vm0, %v554_v0  ;;  %v457_v6 = vld [vmem:[#allocation2 + $0x28] sm:$0xff]   ;;  %v50_v7 = vld [vmem:[%s636_s0] sm:$0xff]  ;;  %v458_v19 = vld [vmem:[#allocation5] sm:$0xff]   ;;  %v288_v48 = vand.u32 127, %v287_v47  ;;  %v329_v63 = vshrl.u32 %v287_v47, 7 }
  0x29   :  { %405 = vmatpush3.bf16.msra.mxu0 %v452_v1  ;;  %v51_v8 = vld [vmem:[%s636_s0 + $0x8] sm:$0xff]  ;;  %v372_v10 = vld [vmem:[%s639_s3] ss:$0 sm:$0xff]  ;;  %421 = vmatpush3.bf16.msra.mxu1 %v458_v19  ;;  %v459_v20 = vld [vmem:[#allocation5 + $0x8] sm:$0xff]  }
  0x2a   :  { %406 = vmatprep.subr.bf16.mxu0 %v554_v0  ;;  %v52_v9 = vpack.c.bf16 %v51_v8, %v50_v7  ;;  %422 = vmatprep.subr.bf16.mxu1 %v554_v0  ;;  %v460_v21 = vld [vmem:[#allocation5 + $0x10] sm:$0xff]   ;;  %v461_v22 = vld [vmem:[#allocation5 + $0x18] sm:$0xff]   ;;  %v462_v23 = vld [vmem:[#allocation5 + $0x20] sm:$0xff]   ;;  %vm289_vm6 = vcmp.lt.s32.totalorder %v288_v48, 8  ;;  %vm335_vm8 = vcmp.lt.s32.totalorder %v329_v63, 2 }
  0x2b   :  { %v463_v24 = vld [vmem:[#allocation5 + $0x28] sm:$0xff]   ;;  %v464_v25 = vld [vmem:[#allocation5 + $0x30] sm:$0xff]   ;;  %v465_v26 = vld [vmem:[#allocation5 + $0x38] sm:$0xff]   ;;  %450 = vset.pattern.permute.xlu1 %v556_v46  ;;  %451 = vset.pattern.permute.xlu0 %v556_v46 }
  0x2c   :  { %v312_v54 = vld [vmem:[%s637_s1] sm:$0xff]  ;;  %s557_s1 = smov [#allocation7]  }
  0x2d   :  { %407 = vmatpush3.bf16.msra.mxu0 %v453_v2  ;;  %423 = vmatpush3.bf16.msra.mxu1 %v459_v20  ;;  %s362_s23 = sshll.u32 %s557_s1, 4  ;;  %s363_s23 = int_to_ptr.vmem [resolvable:$true] %s362_s23 }
  0x2e   :  { %408 = vmatprep.subr.bf16.mxu0 %v554_v0  ;;  %424 = vmatprep.subr.bf16.mxu1 %v554_v0  ;;  %s522_s25 = scalar_lea.vmem %s363_s23, 128  ;;  %p527_p3 = scmp.lt.s32.totalorder %s363_s23, %s363_s23 }
  0x2f   :  { %p523_p2 = scmp.ne.s32.totalorder %s363_s23, %s522_s25  ;;  %p528_p4 = scmp.lt.s32.totalorder %s522_s25, %s522_s25 }
  0x31   :  { %409 = vmatpush3.bf16.msra.mxu0 %v454_v3  ;;  %425 = vmatpush3.bf16.msra.mxu1 %v460_v21  ;;  %p529_p5 = por %p528_p4, %p527_p3 }
  0x32   :  { %410 = vmatprep.subr.bf16.mxu0 %v554_v0  ;;  %426 = vmatprep.subr.bf16.mxu1 %v554_v0 }
  0x33   :  { %p530_p6 = pnand %p529_p5, %p523_p2 }
  0x35   :  { %411 = vmatpush3.bf16.msra.mxu0 %v455_v4  ;;  %427 = vmatpush3.bf16.msra.mxu1 %v461_v22 }
  0x36   :  { %412 = vmatprep.subr.bf16.mxu0 %v554_v0  ;;  %428 = vmatprep.subr.bf16.mxu1 %v554_v0 }
  0x39   :  { %413 = vmatpush3.bf16.msra.mxu0 %v456_v5  ;;  %429 = vmatpush3.bf16.msra.mxu1 %v462_v23 }
  0x3a   :  { %414 = vmatprep.subr.bf16.mxu0 %v554_v0  ;;  %430 = vmatprep.subr.bf16.mxu1 %v554_v0 }
  0x3d   :  { %415 = vmatpush3.bf16.msra.mxu0 %v457_v6  ;;  %431 = vmatpush3.bf16.msra.mxu1 %v463_v24 }
  0x3e   :  { %432 = vmatprep.subr.bf16.mxu1 %v554_v0 }
  0x40   :  { %417 = vmatmul.mubr.msk.bf16.vlgmr.msra.gmra.mrb[0].mxu0 %vm108_vm1, %v52_v9 }
  0x41   :  { %433 = vmatpush3.bf16.msra.mxu1 %v464_v25 }
  0x42   :  { %434 = vmatprep.subr.bf16.mxu1 %v554_v0 }
  0x45   :  { %435 = vmatpush3.bf16.msra.mxu1 %v465_v26 }
 0x113   :  { %v146_v11 = vpop.f32.mrb[0].mxu0 }
 0x114   :  { %v147_v12 = vadd.f32 %v372_v10, %v146_v11  ;;  %v418_v13 = vpop.f32.mrb[1].mxu0 }
 0x115   :  { %v149_v14 = vpop.f32.mrb[2].mxu0 }
 0x116   :  { %v150_v15 = vadd.f32 %v372_v10, %v149_v14  ;;  %v419_v16 = vpop.f32.mrb[3].mxu0  ;;  %v153_v17 = vmul.f32 %v147_v12, %v147_v12 }
 0x118   :  { %155 = vadd.xlane.f32.xlu0 %v153_v17  ;;  %v154_v18 = vmul.f32 %v150_v15, %v150_v15 }
 0x11c   :  { %157 = vadd.xlane.f32.xlu0 %v154_v18 }
 0x1a5   :  { %v156_v27 = vpop.xlane.xlu0 %155 }
 0x1a6   :  { %466 = vrsqrt.f32 %v156_v27  ;;  %vm161_vm2 = vcmp.eq.f32.partialorder %v156_v27, inf  ;;  %v164_v31 = vand.u32 2147483648, %v156_v27  ;;  %vm163_vm3 = vcmp.eq.f32.partialorder %v156_v27, 0.0 }
 0x1a9   :  { %v158_v28 = vpop.xlane.xlu0 %157 }
 0x1aa   :  { %468 = vrsqrt.f32 %v158_v28  ;;  %vm168_vm4 = vcmp.eq.f32.partialorder %v158_v28, inf  ;;  %v171_v37 = vand.u32 2147483648, %v158_v28  ;;  %vm170_vm5 = vcmp.eq.f32.partialorder %v158_v28, 0.0 }
 0x1b0   :  { %v467_v29 = vpop.eup %466 }
 0x1b1   :  { %v160_v30 = vmul.f32 %v467_v29, %v156_v27 }
 0x1b3   :  { %v162_v32 = vsel %vm161_vm2, %v156_v27, %v160_v30 }
 0x1b4   :  { %v469_v33 = vpop.eup %468  ;;  %v165_v34 = vsel %vm163_vm3, %v164_v31, %v162_v32 }
 0x1b5   :  { %v173_v35 = vmax.f32 %v165_v34, 1e-12  ;;  %v167_v36 = vmul.f32 %v469_v33, %v158_v28 }
 0x1b7   :  { %v169_v38 = vsel %vm168_vm4, %v158_v28, %v167_v36  ;;  %470 = vrcp.f32 %v173_v35 }
 0x1b8   :  { %v172_v39 = vsel %vm170_vm5, %v171_v37, %v169_v38 }
 0x1b9   :  { %v174_v40 = vmax.f32 %v172_v39, 1e-12 }
 0x1bb   :  { %472 = vrcp.f32 %v174_v40 }
 0x1c1   :  { %v471_v41 = vpop.eup %470 }
 0x1c2   :  { %v179_v43 = vmul.f32 %v471_v41, %v147_v12 }
 0x1c5   :  { %v473_v42 = vpop.eup %472 }
 0x1c6   :  { %v180_v44 = vmul.f32 %v473_v42, %v150_v15 }
 0x1c8   :  { %v181_v45 = vpack.c.bf16 %v180_v44, %v179_v43 }
 0x1ca   :  { %437 = vmatmul.mubr.bf16.vlgmr.msra.gmra.mrb[0].mxu1 %v181_v45 }
 0x29d   :  { %v280_v49 = vpop.f32.mrb[0].mxu1 }
 0x29e   :  { %v438_v50 = vpop.f32.mrb[1].mxu1  ;;  %v290_v51 = vsel %vm289_vm6, %v280_v49, -1e+30 }
 0x29f   :  { %292 = vmax.xlane.f32.xlu1 %v290_v51  ;;  %v283_v52 = vpop.f32.mrb[2].mxu1 }
 0x2a0   :  { %v439_v53 = vpop.f32.mrb[3].mxu1 }
 0x2b0   :  { %315 = vperm.xlu1 %450, %v312_v54  }
 0x32c   :  { %v293_v55 = vpop.xlane.xlu1 %292 }
 0x32d   :  { %v296_v56 = vsub.f32 %v290_v51, %v293_v55 }
 0x32f   :  { %v298_v57 = vmul.f32 1.442695, %v296_v56 }
 0x330   :  { %v316_v58 = vpop.permute.xlu1 %315 }
 0x331   :  { %474 = vpow2.f32 %v298_v57  ;;  %vm320_vm7 = vcmp.eq.s32.totalorder %v288_v48, %v316_v58 }
 0x332   :  { %v322_v60 = vsel %vm320_vm7, %v280_v49, 0.0 }
 0x33b   :  { %v475_v59 = vpop.eup %474 }
 0x33c   :  { %302 = vadd.xlane.f32.xlu0 %v475_v59 }
 0x340   :  { %324 = vadd.xlane.f32.xlu0 %v322_v60 }
 0x3c9   :  { %v303_v61 = vpop.xlane.xlu0 %302 }
 0x3ca   :  { %476 = vlog2.f32 %v303_v61 }
 0x3cd   :  { %v325_v2 = vpop.xlane.xlu0 %324 }
 0x3d4   :  { %v477_v62 = vpop.eup %476 }
 0x3d5   :  { %v307_v0 = vmul.f32 0.6931472, %v477_v62 }
 0x3d7   :  { %v310_v1 = vadd.f32 %v307_v0, %v293_v55 }
 0x3d9   :  { %v337_v3 = vsub.f32 %v310_v1, %v325_v2 }
 0x3db   :  { %v339_v4 = vsel %vm335_vm8, %v337_v3, 0.0 }
 0x3dc   :  { %v342_v5 = vsel %vm341_vm9, %v339_v4, 0.0 }
 0x3dd   :  { %345 = vadd.xlane.f32.xlu0 %v342_v5 }
 0x46a   :  { %v346_v6 = vpop.xlane.xlu0 %345 }
 0x46b   :  { %v347_v7 = vrot.slane %v346_v6, 4 }
 0x46d   :  { %v348_v8 = vadd.f32 %v347_v7, %v346_v6 }
 0x46f   :  { %v349_v9 = vrot.slane %v348_v8, 2 }
 0x471   :  { %v350_v10 = vadd.f32 %v349_v9, %v348_v8 }
 0x473   :  { %v351_v11 = vrot.slane %v350_v10, 1 }
 0x475   :  { %v352_v12 = vadd.f32 %v351_v11, %v350_v10 }
 0x477   :  { %440 = vpush %v352_v12 }
 0x4a8   :  { %s441_s24 = spop %440 }
 0x4a9   :  { %v354_v13 = vstv %s441_s24 }
 0x4aa   :  { %355 = vst [vmem:[#allocation7] sm:$0xff] %v354_v13 }
 0x4ab   :  { %533 = shalt.err (!%p530_p6)
}
 0x4ac   :  { %s534_s28 = scalar_lea.hbm %s641_s5, 128 }
 0x4ad   :  { %p535_p7 = scmp.ne.s32.totalorder %s641_s5, %s534_s28  ;;  %p538_p8 = scmp.lt.u32.totalorder %s534_s28, %s641_s5 }
 0x4af   :  { %p540_p9 = pnand %p538_p8, %p535_p7 }
 0x4b1   :  { %543 = shalt.err (!%p540_p9)
}
 0x4b2   :  { %365 = dma.vmem_to_hbm [thread:$0]  %s363_s23, 128, %s641_s5, [#allocation4]  }
 0x4b3   :  { %548 = dma.done.wait [#allocation4], 128  }
 0x4b4   :  { %549 = vsyncadd [#allocation4], 4294967168 }
 0x4b5   :  { %369 = vsyncpa [#allocation3], 1 }
 0x4b6   :  { %370 = vsyncpa [#allocation6], 1 }
 0x4b7   :  { %371 = vsyncpa [#allocation4], 1 }

// kernel: tpu_custom_call.1
= control target key start
LH: loop header
LB: loop body
LE: loop exit
PB: predicated region body
PF: predicated region fallthrough
CT: control target
= control target key end

     0   :  { %10 = vsyncpa [#allocation3], 0  ;;  %s636_s0 = inlined_call_operand.vmem [shape: f32[2,96], index: 0, kind: input, shape index: {}]   ;;  %s637_s1 = inlined_call_operand.vmem [shape: s32[2,1], index: 1, kind: input, shape index: {}]   ;;  %s638_s2 = inlined_call_operand.hbm [shape: bf16[96,128], index: 2, kind: input, shape index: {}]   ;;  %s639_s3 = inlined_call_operand.vmem [shape: f32[1,128], index: 3, kind: input, shape index: {}]   ;;  %s640_s4 = inlined_call_operand.hbm [shape: bf16[128,128], index: 4, kind: input, shape index: {}]   ;;  %s641_s5 = inlined_call_operand.hbm [shape: f32[8,128], index: 5, kind: output, shape index: {}]  }
   0x1   :  { %11 = vsyncpa [#allocation6], 0 }
   0x2   :  { %12 = vsyncpa [#allocation4], 0  ;;  %s550_s18 = smov [#allocation2]   ;;  %s478_s22 = scalar_lea.hbm %s638_s2, 768 }
   0x3   :  { %s22_s19 = sshll.u32 %s550_s18, 4  ;;  %p479_p0 = scmp.ne.s32.totalorder %s638_s2, %s478_s22  ;;  %s23_s19 = int_to_ptr.vmem [resolvable:$true] %s22_s19 }
   0x4   :  { %p482_p1 = scmp.lt.u32.totalorder %s478_s22, %s638_s2 }
   0x6   :  { %p484_p2 = pnand %p482_p1, %p479_p0 }
   0x8   :  { %487 = shalt.err (!%p484_p2)
}
   0x9   :  { %s488_s27 = scalar_lea.vmem %s23_s19, 768  ;;  %p493_p4 = scmp.lt.s32.totalorder %s23_s19, %s23_s19 }
   0xa   :  { %p489_p3 = scmp.ne.s32.totalorder %s23_s19, %s488_s27  ;;  %p494_p5 = scmp.lt.s32.totalorder %s488_s27, %s488_s27 }
   0xc   :  { %p495_p6 = por %p494_p5, %p493_p4 }
   0xe   :  { %p496_p7 = pnand %p495_p6, %p489_p3 }
  0x10   :  { %499 = shalt.err (!%p496_p7)
}
  0x11   :  { %s551_s28 = smov 64   ;;  %s552_s29 = smov 4  }
  0x12   :  { %28 = dma.hbm_to_vmem [thread:$0]  %s638_s2, 768, %s23_s19, [#allocation3], %s551_s28, %s551_s28, %s552_s29  }
  0x13   :  { %s553_s7 = smov [#allocation5]   ;;  %s500_s11 = scalar_lea.hbm %s640_s4, 1024 }
  0x14   :  { %s36_s8 = sshll.u32 %s553_s7, 4  ;;  %p501_p8 = scmp.ne.s32.totalorder %s640_s4, %s500_s11  ;;  %s37_s8 = int_to_ptr.vmem [resolvable:$true] %s36_s8 }
  0x15   :  { %p504_p9 = scmp.lt.u32.totalorder %s500_s11, %s640_s4 }
  0x17   :  { %p506_p10 = pnand %p504_p9, %p501_p8 }
  0x19   :  { %509 = shalt.err (!%p506_p10)
}
  0x1a   :  { %s510_s16 = scalar_lea.vmem %s37_s8, 1024  ;;  %p515_p12 = scmp.lt.s32.totalorder %s37_s8, %s37_s8 }
  0x1b   :  { %p511_p11 = scmp.ne.s32.totalorder %s37_s8, %s510_s16  ;;  %p516_p13 = scmp.lt.s32.totalorder %s510_s16, %s510_s16 }
  0x1d   :  { %p517_p0 = por %p516_p13, %p515_p12 }
  0x1f   :  { %p518_p1 = pnand %p517_p0, %p511_p11 }
  0x21   :  { %521 = shalt.err (!%p518_p1)
}
  0x22   :  { %42 = dma.hbm_to_vmem [thread:$0]  %s640_s4, 1024, %s37_s8, [#allocation6], %s551_s28, %s551_s28, %s552_s29  }
  0x23   :  { %544 = dma.done.wait [#allocation3], 768  }
  0x24   :  { %545 = vsyncadd [#allocation3], 4294966528 }
  0x25   :  { %546 = dma.done.wait [#allocation6], 1024  }
  0x26   :  { %547 = vsyncadd [#allocation6], 4294966272  ;;  %v554_v0 = vmov 0.0   ;;  %vm555_vm0 = vmmov 0   ;;  %v452_v1 = vld [vmem:[#allocation2] sm:$0xff]   ;;  %v453_v2 = vld [vmem:[#allocation2 + $0x8] sm:$0xff]   ;;  %v287_v47 = vlaneseq }
  0x27   :  { %404 = vmatprep.subr.bf16.mxu0 %v554_v0  ;;  %416 = vmatprep.mubr.msk.bf16.mxu0 %vm555_vm0, %v554_v0  ;;  %v454_v3 = vld [vmem:[#allocation2 + $0x10] sm:$0xff]   ;;  %v455_v4 = vld [vmem:[#allocation2 + $0x18] sm:$0xff]   ;;  %v456_v5 = vld [vmem:[#allocation2 + $0x20] sm:$0xff]   ;;  %vm108_vm1 = vcmask 785408   ;;  %v556_v46 = vmov 0   ;;  %vm341_vm9 = vcmask 7168  }
  0x28   :  { %420 = vmatprep.subr.bf16.mxu1 %v554_v0  ;;  %436 = vmatprep.mubr.msk.bf16.mxu1 %vm555_vm0, %v554_v0  ;;  %v457_v6 = vld [vmem:[#allocation2 + $0x28] sm:$0xff]   ;;  %v50_v7 = vld [vmem:[%s636_s0] sm:$0xff]  ;;  %v458_v19 = vld [vmem:[#allocation5] sm:$0xff]   ;;  %v288_v48 = vand.u32 127, %v287_v47  ;;  %v329_v63 = vshrl.u32 %v287_v47, 7 }
  0x29   :  { %405 = vmatpush3.bf16.msra.mxu0 %v452_v1  ;;  %v51_v8 = vld [vmem:[%s636_s0 + $0x8] sm:$0xff]  ;;  %v372_v10 = vld [vmem:[%s639_s3] ss:$0 sm:$0xff]  ;;  %421 = vmatpush3.bf16.msra.mxu1 %v458_v19  ;;  %v459_v20 = vld [vmem:[#allocation5 + $0x8] sm:$0xff]  }
  0x2a   :  { %406 = vmatprep.subr.bf16.mxu0 %v554_v0  ;;  %v52_v9 = vpack.c.bf16 %v51_v8, %v50_v7  ;;  %422 = vmatprep.subr.bf16.mxu1 %v554_v0  ;;  %v460_v21 = vld [vmem:[#allocation5 + $0x10] sm:$0xff]   ;;  %v461_v22 = vld [vmem:[#allocation5 + $0x18] sm:$0xff]   ;;  %v462_v23 = vld [vmem:[#allocation5 + $0x20] sm:$0xff]   ;;  %vm289_vm6 = vcmp.lt.s32.totalorder %v288_v48, 8  ;;  %vm335_vm8 = vcmp.lt.s32.totalorder %v329_v63, 2 }
  0x2b   :  { %v463_v24 = vld [vmem:[#allocation5 + $0x28] sm:$0xff]   ;;  %v464_v25 = vld [vmem:[#allocation5 + $0x30] sm:$0xff]   ;;  %v465_v26 = vld [vmem:[#allocation5 + $0x38] sm:$0xff]   ;;  %450 = vset.pattern.permute.xlu1 %v556_v46  ;;  %451 = vset.pattern.permute.xlu0 %v556_v46 }
  0x2c   :  { %v312_v54 = vld [vmem:[%s637_s1] sm:$0xff]  ;;  %s557_s1 = smov [#allocation7]  }
  0x2d   :  { %407 = vmatpush3.bf16.msra.mxu0 %v453_v2  ;;  %423 = vmatpush3.bf16.msra.mxu1 %v459_v20  ;;  %s362_s23 = sshll.u32 %s557_s1, 4  ;;  %s363_s23 = int_to_ptr.vmem [resolvable:$true] %s362_s23 }
  0x2e   :  { %408 = vmatprep.subr.bf16.mxu0 %v554_v0  ;;  %424 = vmatprep.subr.bf16.mxu1 %v554_v0  ;;  %s522_s25 = scalar_lea.vmem %s363_s23, 128  ;;  %p527_p3 = scmp.lt.s32.totalorder %s363_s23, %s363_s23 }
  0x2f   :  { %p523_p2 = scmp.ne.s32.totalorder %s363_s23, %s522_s25  ;;  %p528_p4 = scmp.lt.s32.totalorder %s522_s25, %s522_s25 }
  0x31   :  { %409 = vmatpush3.bf16.msra.mxu0 %v454_v3  ;;  %425 = vmatpush3.bf16.msra.mxu1 %v460_v21  ;;  %p529_p5 = por %p528_p4, %p527_p3 }
  0x32   :  { %410 = vmatprep.subr.bf16.mxu0 %v554_v0  ;;  %426 = vmatprep.subr.bf16.mxu1 %v554_v0 }
  0x33   :  { %p530_p6 = pnand %p529_p5, %p523_p2 }
  0x35   :  { %411 = vmatpush3.bf16.msra.mxu0 %v455_v4  ;;  %427 = vmatpush3.bf16.msra.mxu1 %v461_v22 }
  0x36   :  { %412 = vmatprep.subr.bf16.mxu0 %v554_v0  ;;  %428 = vmatprep.subr.bf16.mxu1 %v554_v0 }
  0x39   :  { %413 = vmatpush3.bf16.msra.mxu0 %v456_v5  ;;  %429 = vmatpush3.bf16.msra.mxu1 %v462_v23 }
  0x3a   :  { %414 = vmatprep.subr.bf16.mxu0 %v554_v0  ;;  %430 = vmatprep.subr.bf16.mxu1 %v554_v0 }
  0x3d   :  { %415 = vmatpush3.bf16.msra.mxu0 %v457_v6  ;;  %431 = vmatpush3.bf16.msra.mxu1 %v463_v24 }
  0x3e   :  { %432 = vmatprep.subr.bf16.mxu1 %v554_v0 }
  0x40   :  { %417 = vmatmul.mubr.msk.bf16.vlgmr.msra.gmra.mrb[0].mxu0 %vm108_vm1, %v52_v9 }
  0x41   :  { %433 = vmatpush3.bf16.msra.mxu1 %v464_v25 }
  0x42   :  { %434 = vmatprep.subr.bf16.mxu1 %v554_v0 }
  0x45   :  { %435 = vmatpush3.bf16.msra.mxu1 %v465_v26 }
 0x113   :  { %v146_v11 = vpop.f32.mrb[0].mxu0 }
 0x114   :  { %v147_v12 = vadd.f32 %v372_v10, %v146_v11  ;;  %v418_v13 = vpop.f32.mrb[1].mxu0 }
 0x115   :  { %v149_v14 = vpop.f32.mrb[2].mxu0 }
 0x116   :  { %v150_v15 = vadd.f32 %v372_v10, %v149_v14  ;;  %v419_v16 = vpop.f32.mrb[3].mxu0  ;;  %v153_v17 = vmul.f32 %v147_v12, %v147_v12 }
 0x118   :  { %155 = vadd.xlane.f32.xlu0 %v153_v17  ;;  %v154_v18 = vmul.f32 %v150_v15, %v150_v15 }
 0x11c   :  { %157 = vadd.xlane.f32.xlu0 %v154_v18 }
 0x1a5   :  { %v156_v27 = vpop.xlane.xlu0 %155 }
 0x1a6   :  { %466 = vrsqrt.f32 %v156_v27  ;;  %vm161_vm2 = vcmp.eq.f32.partialorder %v156_v27, inf  ;;  %v164_v31 = vand.u32 2147483648, %v156_v27  ;;  %vm163_vm3 = vcmp.eq.f32.partialorder %v156_v27, 0.0 }
 0x1a9   :  { %v158_v28 = vpop.xlane.xlu0 %157 }
 0x1aa   :  { %468 = vrsqrt.f32 %v158_v28  ;;  %vm168_vm4 = vcmp.eq.f32.partialorder %v158_v28, inf  ;;  %v171_v37 = vand.u32 2147483648, %v158_v28  ;;  %vm170_vm5 = vcmp.eq.f32.partialorder %v158_v28, 0.0 }
 0x1b0   :  { %v467_v29 = vpop.eup %466 }
 0x1b1   :  { %v160_v30 = vmul.f32 %v467_v29, %v156_v27 }
 0x1b3   :  { %v162_v32 = vsel %vm161_vm2, %v156_v27, %v160_v30 }
 0x1b4   :  { %v469_v33 = vpop.eup %468  ;;  %v165_v34 = vsel %vm163_vm3, %v164_v31, %v162_v32 }
 0x1b5   :  { %v173_v35 = vmax.f32 %v165_v34, 1e-12  ;;  %v167_v36 = vmul.f32 %v469_v33, %v158_v28 }
 0x1b7   :  { %v169_v38 = vsel %vm168_vm4, %v158_v28, %v167_v36  ;;  %470 = vrcp.f32 %v173_v35 }
 0x1b8   :  { %v172_v39 = vsel %vm170_vm5, %v171_v37, %v169_v38 }
 0x1b9   :  { %v174_v40 = vmax.f32 %v172_v39, 1e-12 }
 0x1bb   :  { %472 = vrcp.f32 %v174_v40 }
 0x1c1   :  { %v471_v41 = vpop.eup %470 }
 0x1c2   :  { %v179_v43 = vmul.f32 %v471_v41, %v147_v12 }
 0x1c5   :  { %v473_v42 = vpop.eup %472 }
 0x1c6   :  { %v180_v44 = vmul.f32 %v473_v42, %v150_v15 }
 0x1c8   :  { %v181_v45 = vpack.c.bf16 %v180_v44, %v179_v43 }
 0x1ca   :  { %437 = vmatmul.mubr.bf16.vlgmr.msra.gmra.mrb[0].mxu1 %v181_v45 }
 0x29d   :  { %v280_v49 = vpop.f32.mrb[0].mxu1 }
 0x29e   :  { %v438_v50 = vpop.f32.mrb[1].mxu1  ;;  %v290_v51 = vsel %vm289_vm6, %v280_v49, -1e+30 }
 0x29f   :  { %292 = vmax.xlane.f32.xlu1 %v290_v51  ;;  %v283_v52 = vpop.f32.mrb[2].mxu1 }
 0x2a0   :  { %v439_v53 = vpop.f32.mrb[3].mxu1 }
 0x2b0   :  { %315 = vperm.xlu1 %450, %v312_v54  }
 0x32c   :  { %v293_v55 = vpop.xlane.xlu1 %292 }
 0x32d   :  { %v296_v56 = vsub.f32 %v290_v51, %v293_v55 }
 0x32f   :  { %v298_v57 = vmul.f32 1.442695, %v296_v56 }
 0x330   :  { %v316_v58 = vpop.permute.xlu1 %315 }
 0x331   :  { %474 = vpow2.f32 %v298_v57  ;;  %vm320_vm7 = vcmp.eq.s32.totalorder %v288_v48, %v316_v58 }
 0x332   :  { %v322_v60 = vsel %vm320_vm7, %v280_v49, 0.0 }
 0x33b   :  { %v475_v59 = vpop.eup %474 }
 0x33c   :  { %302 = vadd.xlane.f32.xlu0 %v475_v59 }
 0x340   :  { %324 = vadd.xlane.f32.xlu0 %v322_v60 }
 0x3c9   :  { %v303_v61 = vpop.xlane.xlu0 %302 }
 0x3ca   :  { %476 = vlog2.f32 %v303_v61 }
 0x3cd   :  { %v325_v2 = vpop.xlane.xlu0 %324 }
 0x3d4   :  { %v477_v62 = vpop.eup %476 }
 0x3d5   :  { %v307_v0 = vmul.f32 0.6931472, %v477_v62 }
 0x3d7   :  { %v310_v1 = vadd.f32 %v307_v0, %v293_v55 }
 0x3d9   :  { %v337_v3 = vsub.f32 %v310_v1, %v325_v2 }
 0x3db   :  { %v339_v4 = vsel %vm335_vm8, %v337_v3, 0.0 }
 0x3dc   :  { %v342_v5 = vsel %vm341_vm9, %v339_v4, 0.0 }
 0x3dd   :  { %345 = vadd.xlane.f32.xlu0 %v342_v5 }
 0x46a   :  { %v346_v6 = vpop.xlane.xlu0 %345 }
 0x46b   :  { %v347_v7 = vrot.slane %v346_v6, 4 }
 0x46d   :  { %v348_v8 = vadd.f32 %v347_v7, %v346_v6 }
 0x46f   :  { %v349_v9 = vrot.slane %v348_v8, 2 }
 0x471   :  { %v350_v10 = vadd.f32 %v349_v9, %v348_v8 }
 0x473   :  { %v351_v11 = vrot.slane %v350_v10, 1 }
 0x475   :  { %v352_v12 = vadd.f32 %v351_v11, %v350_v10 }
 0x477   :  { %440 = vpush %v352_v12 }
 0x4a8   :  { %s441_s24 = spop %440 }
 0x4a9   :  { %v354_v13 = vstv %s441_s24 }
 0x4aa   :  { %355 = vst [vmem:[#allocation7] sm:$0xff] %v354_v13 }
 0x4ab   :  { %533 = shalt.err (!%p530_p6)
}
 0x4ac   :  { %s534_s28 = scalar_lea.hbm %s641_s5, 128 }
 0x4ad   :  { %p535_p7 = scmp.ne.s32.totalorder %s641_s5, %s534_s28  ;;  %p538_p8 = scmp.lt.u32.totalorder %s534_s28, %s641_s5 }
 0x4af   :  { %p540_p9 = pnand %p538_p8, %p535_p7 }
 0x4b1   :  { %543 = shalt.err (!%p540_p9)
}
 0x4b2   :  { %365 = dma.vmem_to_hbm [thread:$0]  %s363_s23, 128, %s641_s5, [#allocation4]  }
 0x4b3   :  { %548 = dma.done.wait [#allocation4], 128  }
 0x4b4   :  { %549 = vsyncadd [#allocation4], 4294967168 }
 0x4b5   :  { %369 = vsyncpa [#allocation3], 1 }
 0x4b6   :  { %370 = vsyncpa [#allocation6], 1 }
 0x4b7   :  { %371 = vsyncpa [#allocation4], 1 }

</bundles_post_ra>
